<compile_context>
chip_gen: v6e
topology: v6e:2x2x1
jax: 0.10.0
libtpu: 0.0.40
codegen_flags: <defaults>
</compile_context>

<pallas_src>
import functools
import math

import jax
import jax.numpy as jnp
from jax.experimental import pallas as pl
from jax.experimental.pallas import tpu as pltpu


def _round_up(x: int, m: int) -> int:
    return -(-x // m) * m


def _fixed_pos_emb_kernel(tab_ref, out_ref, *, group, groupp, fold):
    """out_ref block: (tile_rows, fold*dim); output row r holds positions
    base + r*fold .. base + r*fold + fold - 1, each laid out [sin(half)|cos(half)].

    tab_ref (constant input, pinned at block (0, 0)):
      rows [0, group)              : P = sin(A) on sin lanes, cos(A) on cos lanes
      rows [groupp, groupp+group)  : Q = cos(A) on sin lanes, -sin(A) on cos lanes
      row 2*groupp + 0             : delta    = fold * inv_freq         (per lane)
      row 2*groupp + 1             : off0     = pos_in_fold * inv_freq  (per lane)
      row 2*groupp + 2             : inv_freq                           (per lane)
    where A(r, lane) = r * delta(lane), r in [0, group).
    """
    tile_rows, _ = out_ref.shape
    num_q = tile_rows // group          # static; wrapper guarantees divisibility

    c = 2 * groupp
    delta = tab_ref[c + 0:c + 1, :]     # (1, lanes)
    off0 = tab_ref[c + 1:c + 2, :]      # (1, lanes)
    invf = tab_ref[c + 2:c + 3, :]      # (1, lanes)

    # Angle contribution of this block's first row (block-base position).
    base = jnp.asarray(pl.program_id(0) * (tile_rows * fold), dtype=jnp.float32)
    off = base * invf + off0            # (1, lanes)

    @pl.loop(0, num_q)
    def _(g):
        # The ONLY sin/cos in the kernel: one (1, lanes) row per `group` output
        # rows, so the transcendental cost is ~1/group per output element.
        gbase = jnp.asarray(g * group, dtype=jnp.float32)
        b = off + gbase * delta
        sb = jnp.sin(b)
        cb = jnp.cos(b)
        start = pl.multiple_of(g * group, group)
        # sin lanes:  sin(A)cos(B) + cos(A)sin(B) = sin(A+B)
        # cos lanes:  cos(A)cos(B) - sin(A)sin(B) = cos(A+B)   (true cos, no drift)
        tile = (tab_ref[0:group, :] * cb
                + tab_ref[groupp:groupp + group, :] * sb)
        out_ref[pl.ds(start, group), :] = tile.astype(out_ref.dtype)


def fixed_positional_embedding(x: jax.Array, dim: int,
                               out_dtype=jnp.float32) -> jax.Array:
    """Equivalent of FixedPositionalEmbedding(dim).forward(x) -> (T, dim).

    Only x.shape[1] (the sequence length) is used, exactly like the PyTorch
    module.  out_dtype=jnp.bfloat16 halves HBM writeback (recommended where
    downstream numerics allow); default float32 matches the PyTorch module.
    """
    assert dim % 2 == 0, "dim must be even"
    seq_len = x.shape[1]
    # Positions are formed in float32 inside the kernel: exact only below 2**24.
    assert seq_len < (1 << 24), "seq_len too large for exact f32 positions"

    itemsize = jnp.dtype(out_dtype).itemsize
    sub = 16 if itemsize <= 2 else 8        # sublane packing granularity

    # ---- lane folding: lane-dense (multiple of 128) stores for every dim ----
    fold = 128 // math.gcd(dim, 128)        # smallest fold with fold*dim % 128 == 0
    if fold * dim > 4096:                   # cap row width for pathological dims;
        fold = 1                            # still correct, just masked stores.
    lanes = fold * dim
    rows = pl.cdiv(seq_len, fold)           # seq padded up to a multiple of fold

    # ---- block size: ~8 MiB of output per block (double-buffered < 32 MiB) ----
    bytes_per_row = lanes * itemsize
    target_rows = max(sub, ((8 << 20) // bytes_per_row) // sub * sub)
    if rows <= target_rows:
        if rows >= 2 * sub:
            # Two near-equal blocks so both v7x TensorCores get a share.
            tile_rows = _round_up(pl.cdiv(rows, 2), sub)
        else:
            tile_rows = rows                # single tiny full-extent block
    else:
        tile_rows = target_rows
    grid_steps = pl.cdiv(rows, tile_rows)

    # ---- row-group size for the angle-addition seed (must divide tile_rows) ----
    if tile_rows % sub == 0:
        group = math.gcd(tile_rows, 128)
    else:
        group = tile_rows                   # tiny full-extent block: one group
    groupp = _round_up(group, 8)            # 8-aligned slots for P and Q in the table

    # ---- constant tables: computed once with plain jnp, outside the kernel ----
    half = dim // 2
    col = jnp.arange(lanes, dtype=jnp.int32)
    f_idx = col % dim
    k_idx = jnp.where(f_idx < half, f_idx, f_idx - half)
    inv_freq = 1.0 / (10000.0 ** ((2.0 * k_idx.astype(jnp.float32)) / dim))
    pos_in_fold = (col // dim).astype(jnp.float32)
    is_sin = f_idx < half
    delta = inv_freq * float(fold)
    off0 = pos_in_fold * inv_freq

    r = jnp.arange(group, dtype=jnp.float32)[:, None]
    a = r * delta[None, :]                              # (group, lanes)
    sa, ca = jnp.sin(a), jnp.cos(a)
    p_tab = jnp.where(is_sin[None, :], sa, ca)
    q_tab = jnp.where(is_sin[None, :], ca, -sa)

    pad_g = jnp.zeros((groupp - group, lanes), jnp.float32)
    tab = jnp.concatenate(
        [p_tab, pad_g, q_tab, pad_g,
         delta[None, :], off0[None, :], inv_freq[None, :],
         jnp.zeros((5, lanes), jnp.float32)], axis=0)   # (2*groupp + 8, lanes)

    kernel = functools.partial(_fixed_pos_emb_kernel,
                               group=group, groupp=groupp, fold=fold)
    out = pl.pallas_call(
        kernel,
        out_shape=jax.ShapeDtypeStruct((rows, lanes), out_dtype),
        grid=(grid_steps,),
        in_specs=[pl.BlockSpec(tab.shape, lambda i: (0, 0))],   # pinned constant
        out_specs=pl.BlockSpec((tile_rows, lanes), lambda i: (i, 0)),
        compiler_params=pltpu.CompilerParams(
            dimension_semantics=("parallel",),
            vmem_limit_bytes=32 * 1024 * 1024,
        ),
    )(tab)
    # Row-major (rows, fold*dim) -> (rows*fold, dim); drop the fold padding.
    return out.reshape(rows * fold, dim)[:seq_len]


def _reference(seq_len: int, dim: int) -> jax.Array:
    # Pure-JAX mirror of the PyTorch forward.
    inv_freq = 1.0 / (10000.0 ** (jnp.arange(0, dim, 2, dtype=jnp.float32) / dim))
    pos = jnp.arange(seq_len, dtype=jnp.float32)
    sinusoid = pos[:, None] * inv_freq
    return jnp.concatenate([jnp.sin(sinusoid), jnp.cos(sinusoid)], axis=-1)


if __name__ == "__main__":
    key = jax.random.PRNGKey(0)

    # Small shapes consistent with the module: (batch, seq, dim).
    batch, seq, dim = 2, 8, 32
    x = jax.random.normal(key, (batch, seq, dim), dtype=jnp.float32)

    emb = fixed_positional_embedding(x, dim)
    emb = jax.block_until_ready(emb)
    ref = _reference(seq, dim)
    assert emb.shape == (seq, dim), emb.shape
    assert emb.dtype == jnp.float32, emb.dtype
    err = float(jnp.max(jnp.abs(emb - ref)))
    assert err < 1e-5, err

    # Larger dim: multi-step grid, two near-equal blocks, masked tail block.
    seq2, dim2 = 72, 256
    x2 = jnp.zeros((1, seq2, dim2), dtype=jnp.float32)
    emb2 = jax.block_until_ready(fixed_positional_embedding(x2, dim2))
    ref2 = _reference(seq2, dim2)
    assert emb2.shape == (seq2, dim2), emb2.shape
    err2 = float(jnp.max(jnp.abs(emb2 - ref2)))
    assert err2 < 1e-4, err2

    # Non-power-of-two dim + seq not divisible by fold: exercises the
    # generalized lane folding (fold=4, lanes=384) and the fold padding path.
    seq3, dim3 = 50, 96
    x3 = jnp.zeros((1, seq3, dim3), dtype=jnp.float32)
    emb3 = jax.block_until_ready(fixed_positional_embedding(x3, dim3))
    ref3 = _reference(seq3, dim3)
    assert emb3.shape == (seq3, dim3), emb3.shape
    err3 = float(jnp.max(jnp.abs(emb3 - ref3)))
    assert err3 < 1e-5, err3

    print("KERNEL_OK")
</pallas_src>

<mosaic_0001>
module attributes {stable_mosaic.version = 11 : i64} {
  func.func @_fixed_pos_emb_kernel(%arg0: i32, %arg1: memref<24x128xf32, #tpu.memory_space<vmem>>, %arg2: memref<2x128xf32, #tpu.memory_space<vmem>>) attributes {dimension_semantics = [#tpu.dimension_semantics<parallel>], iteration_bounds = array<i64: 1>, scalar_prefetch = 0 : i64, scratch_operands = 0 : i64, tpu.core_type = #tpu.core_type<tc>, window_params = [{pipeline_mode = #tpu.pipeline_mode<synchronous>, transform_indices = @transform_0, window_bounds = array<i64: 24, 128>}, {transform_indices = @transform_1, window_bounds = array<i64: 2, 128>}]} {
    %c16 = arith.constant 16 : index
    %c0 = arith.constant 0 : index
    %0 = vector.load %arg1[%c16, %c0] : memref<24x128xf32, #tpu.memory_space<vmem>>, vector<1x128xf32>
    %c17 = arith.constant 17 : index
    %c0_0 = arith.constant 0 : index
    %1 = vector.load %arg1[%c17, %c0_0] : memref<24x128xf32, #tpu.memory_space<vmem>>, vector<1x128xf32>
    %c18 = arith.constant 18 : index
    %c0_1 = arith.constant 0 : index
    %2 = vector.load %arg1[%c18, %c0_1] : memref<24x128xf32, #tpu.memory_space<vmem>>, vector<1x128xf32>
    %c8_i32 = arith.constant 8 : i32
    %3 = arith.muli %arg0, %c8_i32 : i32
    %4 = arith.sitofp %3 : i32 to f32
    %5 = vector.broadcast %4 : f32 to vector<1x128xf32>
    %6 = arith.mulf %5, %2 : vector<1x128xf32>
    %7 = arith.addf %6, %1 : vector<1x128xf32>
    %c0_i32 = arith.constant 0 : i32
    %c1_i32 = arith.constant 1 : i32
    %8 = arith.muli %c0_i32, %c1_i32 : i32
    %c0_i32_2 = arith.constant 0 : i32
    %9 = arith.addi %c0_i32_2, %8 : i32
    %c2_i32 = arith.constant 2 : i32
    %10 = arith.muli %9, %c2_i32 : i32
    %11 = arith.sitofp %10 : i32 to f32
    %12 = vector.broadcast %11 : f32 to vector<1x128xf32>
    %13 = arith.mulf %12, %0 : vector<1x128xf32>
    %14 = arith.addf %7, %13 : vector<1x128xf32>
    %15 = math.sin %14 : vector<1x128xf32>
    %16 = math.cos %14 : vector<1x128xf32>
    %c2_i32_3 = arith.constant 2 : i32
    %17 = arith.muli %9, %c2_i32_3 : i32
    %18 = tpu.assume_multiple %17, 2 : i32
    %c0_4 = arith.constant 0 : index
    %c0_5 = arith.constant 0 : index
    %19 = vector.load %arg1[%c0_4, %c0_5] : memref<24x128xf32, #tpu.memory_space<vmem>>, vector<2x128xf32>
    %20 = vector.broadcast %16 : vector<1x128xf32> to vector<2x128xf32>
    %21 = arith.mulf %19, %20 : vector<2x128xf32>
    %c8 = arith.constant 8 : index
    %c0_6 = arith.constant 0 : index
    %22 = vector.load %arg1[%c8, %c0_6] : memref<24x128xf32, #tpu.memory_space<vmem>>, vector<2x128xf32>
    %23 = vector.broadcast %15 : vector<1x128xf32> to vector<2x128xf32>
    %24 = arith.mulf %22, %23 : vector<2x128xf32>
    %25 = arith.addf %21, %24 : vector<2x128xf32>
    %26 = arith.index_cast %18 : i32 to index
    %c0_7 = arith.constant 0 : index
    %27 = vector.load %arg2[%26, %c0_7] : memref<2x128xf32, #tpu.memory_space<vmem>>, vector<2x128xf32>
    tpu.vector_store %arg2[%26, %c0_7], %25 {strides = array<i32>} : memref<2x128xf32, #tpu.memory_space<vmem>>, vector<2x128xf32>,
    %c1_i32_8 = arith.constant 1 : i32
    return
  }
  func.func @transform_0(%arg0: i32) -> (i32, i32) {
    %c0_i32 = arith.constant 0 : i32
    %c0_i32_0 = arith.constant 0 : i32
    %c0_i32_1 = arith.constant 0 : i32
    return %c0_i32, %c0_i32_0 : i32, i32
  }
  func.func @transform_1(%arg0: i32) -> (i32, i32) {
    %c0_i32 = arith.constant 0 : i32
    %c0_i32_0 = arith.constant 0 : i32
    return %arg0, %c0_i32 : i32, i32
  }
}

</mosaic_0001>

<bundles_post_ra>
// kernel: tpu_custom_call.1
= control target key start
LH: loop header
LB: loop body
LE: loop exit
PB: predicated region body
PF: predicated region fallthrough
CT: control target
= control target key end

     0   :  { %6 = vsyncpa [#allocation3], 0  ;;  %s386_s0 = inlined_call_operand.hbm [shape: f32[24,128], index: 0, kind: input, shape index: {}]   ;;  %s387_s1 = inlined_call_operand.hbm [shape: f32[2,128], index: 1, kind: output, shape index: {}]  }
   0x1   :  { %7 = vsyncpa [#allocation4], 0  ;;  %s339_s6 = smov [#allocation2]  }
   0x2   :  { %s13_s7 = sshll.u32 %s339_s6, 4  ;;  %s14_s7 = int_to_ptr.vmem [resolvable:$true] %s13_s7 }
   0x3   :  { %s303_s8 = scalar_lea.vmem %s14_s7, 384  ;;  %p308_p1 = scmp.lt.s32.totalorder %s14_s7, %s14_s7 }
   0x4   :  { %p304_p0 = scmp.ne.s32.totalorder %s14_s7, %s303_s8  ;;  %p309_p2 = scmp.lt.s32.totalorder %s303_s8, %s303_s8 }
   0x6   :  { %p310_p3 = por %p309_p2, %p308_p1 }
   0x8   :  { %p311_p4 = pnand %p310_p3, %p304_p0 }
   0xa   :  { %314 = shalt.err (!%p311_p4)
}
   0xb   :  { %s340_s9 = smov 128   ;;  %s341_s10 = smov 8  }
   0xc   :  { %19 = dma.hbm_to_vmem [thread:$0]  %s386_s0, 384, %s14_s7, [#allocation3], %s340_s9, %s340_s9, %s341_s10  }
   0xd   :  { %335 = dma.done.wait [#allocation3], 384  }
   0xe   :  { %336 = vsyncadd [#allocation3], 4294966912  ;;  %v23_v0 = vld [vmem:[#allocation2 + $0x10] sm:$0x1]  ;;  %v24_v1 = vld [vmem:[#allocation2 + $0x11] sm:$0x1] }
   0xf   :  { %v25_v2 = vld [vmem:[#allocation2 + $0x12] sm:$0x1]  ;;  %v31_v4 = vmul.f32 0.0, %v23_v0  ;;  %v342_v18 = vmov 683565275   ;;  %s348_s0 = smov [#allocation5]  }
  0x10   :  { %v29_v3 = vmul.f32 0.0, %v25_v2  ;;  %v343_v20 = vmov 2475754826   ;;  %v344_v22 = vmov 2131351028   ;;  %s260_s13 = sshll.u32 %s348_s0, 4  ;;  %s261_s13 = int_to_ptr.vmem [resolvable:$true] %s260_s13 }
  0x11   :  { %v345_v24 = vmov 2102212464   ;;  %v346_v26 = vmov 920167782   ;;  %v347_v33 = vmov 1326507024   ;;  %p320_p6 = scmp.lt.s32.totalorder %s261_s13, %s261_s13 }
  0x12   :  { %v30_v5 = vadd.f32 %v29_v3, %v24_v1  ;;  %s315_s14 = scalar_lea.vmem %s261_s13, 32 }
  0x13   :  { %p316_p5 = scmp.ne.s32.totalorder %s261_s13, %s315_s14  ;;  %p321_p7 = scmp.lt.s32.totalorder %s315_s14, %s315_s14 }
  0x14   :  { %v362_v6 = vadd.f32 %v31_v4, %v30_v5 }
  0x15   :  { %p322_p8 = por %p321_p7, %p320_p6 }
  0x16   :  { %v36_v7 = vand.u32 2139095040, %v362_v6  ;;  %v33_v9 = vand.u32 2147483647, %v362_v6  ;;  %vm35_vm7 = vcmp.lt.s32.totalorder %v362_v6, 0  ;;  %vm125_vm15 = vweird.f32 %v362_v6 }
  0x17   :  { %p323_p9 = pnand %p322_p8, %p316_p5 }
  0x18   :  { %v37_v8 = vshrl.u32 %v36_v7, 23  ;;  %v40_v12 = vand.u32 8388607, %v33_v9  ;;  %vm34_vm8 = vcmp.le.f32.partialorder %v33_v9, 0.7853982 }
  0x1a   :  { %v269_v10 = vadd.s32 4294967169, %v37_v8  ;;  %v41_v15 = vor.u32 8388608, %v40_v12 }
  0x1c   :  { %v43_v11 = vadd.s32 1, %v269_v10  ;;  %v81_v35 = vshll.u32 %v41_v15, 8 }
  0x1e   :  { %vm44_vm0 = vcmp.gt.s32.totalorder %v43_v11, 0 }
  0x1f   :  { %v45_v13 = vsel %vm44_vm0, %v43_v11, 0 }
  0x20   :  { %v47_v14 = vand.u32 31, %v45_v13  ;;  %v46_v16 = vshrl.u32 %v45_v13, 5 }
  0x22   :  { %v48_v17 = vsub.s32 32, %v47_v14  ;;  %v50_v19 = vshll.u32 %v342_v18, %v47_v14  ;;  %v53_v21 = vshll.u32 %v343_v20, %v47_v14  ;;  %v56_v23 = vshll.u32 %v344_v22, %v47_v14 }
  0x23   :  { %v59_v25 = vshll.u32 %v345_v24, %v47_v14  ;;  %v62_v27 = vshll.u32 %v346_v26, %v47_v14  ;;  %vm65_vm1 = vcmp.lt.s32.totalorder %v46_v16, 1  ;;  %vm68_vm2 = vcmp.lt.s32.totalorder %v46_v16, 4 }
  0x24   :  { %v49_v28 = vshrl.u32 %v342_v18, %v48_v17  ;;  %v51_v29 = vshrl.u32 %v343_v20, %v48_v17  ;;  %v54_v30 = vshrl.u32 %v344_v22, %v48_v17  ;;  %v57_v31 = vshrl.u32 %v345_v24, %v48_v17 }
  0x25   :  { %v60_v32 = vshrl.u32 %v346_v26, %v48_v17  ;;  %v63_v34 = vshrl.u32 %v347_v33, %v48_v17  ;;  %vm66_vm3 = vcmp.lt.s32.totalorder %v46_v16, 2  ;;  %vm67_vm4 = vcmp.lt.s32.totalorder %v46_v16, 3 }
  0x26   :  { %v52_v36 = vor.u32 %v51_v29, %v50_v19  ;;  %v55_v37 = vor.u32 %v54_v30, %v53_v21  ;;  %v58_v38 = vor.u32 %v57_v31, %v56_v23 }
  0x27   :  { %v61_v39 = vor.u32 %v60_v32, %v59_v25  ;;  %v64_v40 = vor.u32 %v63_v34, %v62_v27  ;;  %v241_v27 = vlaneseq }
  0x28   :  { %v69_v41 = vsel %vm65_vm1, %v49_v28, %v52_v36  ;;  %v70_v42 = vsel %vm68_vm2, %v58_v38, 2102212464  ;;  %v73_v43 = vsel %vm65_vm1, %v52_v36, %v55_v37  ;;  %v77_v44 = vsel %vm65_vm1, %v55_v37, %v58_v38 }
  0x29   :  { %v71_v45 = vsel %vm67_vm4, %v55_v37, %v70_v42  ;;  %v74_v46 = vsel %vm68_vm2, %v61_v39, 920167782  ;;  %v78_v47 = vsel %vm68_vm2, %v64_v40, 1326507024  ;;  %v242_v30 = vshrl.u32 %v241_v27, 7 }
  0x2a   :  { %v75_v48 = vsel %vm67_vm4, %v58_v38, %v74_v46  ;;  %v79_v49 = vsel %vm67_vm4, %v61_v39, %v78_v47  ;;  %v72_v50 = vsel %vm66_vm3, %v69_v41, %v71_v45 }
  0x2b   :  { %v76_v51 = vsel %vm66_vm3, %v73_v43, %v75_v48  ;;  %v80_v52 = vsel %vm66_vm3, %v77_v44, %v79_v49  ;;  %v88_v57 = vmul.u32 %v81_v35, %v72_v50  ;;  %v243_v36 = vsub.s32 0, %v242_v30  ;;  %v240_v43 = vld [vmem:[#allocation2] sm:$0x3]  ;;  %v246_v44 = vld [vmem:[#allocation2 + $0x8] sm:$0x3] }
  0x2c   :  { %v368_v53 = vmul.u32.u64.low %v81_v35, %v80_v52  ;;  %v369_v54 = vmul.u32.u64.high %v81_v35, %v80_v52, %v368_v53  ;;  %v371_v55 = vmul.u32.u64.low %v81_v35, %v76_v51  ;;  %v372_v56 = vmul.u32.u64.high %v81_v35, %v76_v51, %v371_v55 }
  0x2e   :  { %vm90_vm5 = vc.u32 %v369_v54, %v371_v55  ;;  %v91_v58 = vadd.s32 1, %v372_v56  ;;  %v89_v5 = vadd.s32 %v371_v55, %v369_v54 }
  0x30   :  { %v92_v59 = vsel %vm90_vm5, %v91_v58, %v372_v56 }
  0x31   :  { %v93_v60 = vadd.s32 %v92_v59, %v88_v57 }
  0x33   :  { %v94_v61 = vadd.s32 536870912, %v93_v60 }
  0x35   :  { %v95_v62 = vshrl.u32 %v94_v61, 30 }
  0x37   :  { %v96_v63 = vshll.u32 %v95_v62, 30  ;;  %v119_v20 = vsub.s32 4, %v95_v62 }
  0x39   :  { %v97_v0 = vsub.s32 %v93_v60, %v96_v63  ;;  %v120_v23 = vsel %vm35_vm7, %v119_v20, %v95_v62 }
  0x3a   :  { %v122_v25 = vsel %vm34_vm8, 0, %v120_v23 }
  0x3b   :  { %v99_v1 = vsub.s32 0, %v97_v0  ;;  %v126_v26 = vadd.s32 3, %v122_v25  ;;  %v230_v29 = vand.u32 3, %v122_v25 }
  0x3d   :  { %v270_v2 = vmin.u32 %v99_v1, %v97_v0  ;;  %v127_v28 = vand.u32 3, %v126_v26  ;;  %vm235_vm10 = vcmp.eq.s32.totalorder %v230_v29, 2  ;;  %vm232_vm12 = vcmp.eq.s32.totalorder %v230_v29, 0 }
  0x3e   :  { %vm231_vm14 = vcmp.lt.s32.totalorder %v230_v29, 2 }
  0x3f   :  { %v101_v3 = vclz %v270_v2  ;;  %vm132_vm9 = vcmp.eq.s32.totalorder %v127_v28, 2  ;;  %vm129_vm11 = vcmp.eq.s32.totalorder %v127_v28, 0  ;;  %vm128_vm13 = vcmp.lt.s32.totalorder %v127_v28, 2 }
  0x41   :  { %v271_v4 = vadd.s32 4294967294, %v101_v3 }
  0x43   :  { %vm272_vm6 = vcmp.lt.s32.totalorder %v271_v4, 0 }
  0x44   :  { %v104_v7 = vsel %vm272_vm6, 0, %v271_v4 }
  0x45   :  { %v105_v8 = vsub.s32 32, %v104_v7  ;;  %v106_v10 = vshll.u32 %v97_v0, %v104_v7  ;;  %v109_v11 = vsub.s32 4294967266, %v104_v7 }
  0x47   :  { %v107_v12 = vshrl.u32 %v89_v5, %v105_v8  ;;  %v110_v13 = vadd.s32 127, %v109_v11 }
  0x49   :  { %v108_v14 = vor.u32 %v107_v12, %v106_v10  ;;  %v111_v15 = vshll.u32 %v110_v13, 23 }
  0x4b   :  { %v112_v16 = vor.u32 4788187, %v111_v15  ;;  %v115_v17 = vcvt.s32.f32 %v108_v14 }
  0x4d   :  { %v113_v18 = vand.u32 2147483647, %v112_v16 }
  0x4f   :  { %v116_v19 = vmul.f32 %v115_v17, %v113_v18 }
  0x51   :  { %v117_v21 = vxor.u32 2147483648, %v116_v19 }
  0x53   :  { %v118_v22 = vsel %vm35_vm7, %v117_v21, %v116_v19 }
  0x54   :  { %v121_v24 = vsel %vm34_vm8, %v362_v6, %v118_v22 }
  0x55   :  { %291 = vcosq.f32 %v121_v24 }
  0x56   :  { %293 = vsinq.f32 %v121_v24 }
  0x62   :  { %v292_v31 = vpop.eup %291 }
  0x63   :  { %v294_v32 = vpop.eup %293  ;;  %v133_v33 = vxor.u32 2147483648, %v292_v31 }
  0x64   :  { %v130_v9 = vxor.u32 2147483648, %v294_v32 }
  0x65   :  { %v134_v34 = vsel %vm132_vm9, %v133_v33, %v294_v32  ;;  %v237_v35 = vsel %vm235_vm10, %v133_v33, %v294_v32 }
  0x66   :  { %v131_v37 = vsel %vm129_vm11, %v292_v31, %v130_v9  ;;  %v234_v38 = vsel %vm232_vm12, %v292_v31, %v130_v9 }
  0x67   :  { %v135_v39 = vsel %vm128_vm13, %v131_v37, %v134_v34  ;;  %v238_v40 = vsel %vm231_vm14, %v234_v38, %v237_v35 }
  0x68   :  { %v136_v41 = vsel %vm125_vm15, nan, %v135_v39  ;;  %v239_v42 = vsel %vm125_vm15, nan, %v238_v40 }
  0x69   :  { %v244_v45 = vrot.slane %v239_v42, %v243_v36  ;;  %v250_v46 = vrot.slane %v136_v41, %v243_v36 }
  0x6b   :  { %v245_v47 = vmul.f32 %v244_v45, %v240_v43  ;;  %v251_v48 = vmul.f32 %v250_v46, %v246_v44 }
  0x6d   :  { %v252_v49 = vadd.f32 %v251_v48, %v245_v47 }
  0x6f   :  { %253 = vst [vmem:[#allocation5] sm:$0x3] %v252_v49 }
  0x70   :  { %326 = shalt.err (!%p323_p9)
}
  0x71   :  { %263 = dma.vmem_to_hbm [thread:$0]  %s261_s13, 32, %s387_s1, [#allocation4]  }
  0x72   :  { %337 = dma.done.wait [#allocation4], 32  }
  0x73   :  { %338 = vsyncadd [#allocation4], 4294967264 }
  0x74   :  { %267 = vsyncpa [#allocation3], 1 }
  0x75   :  { %268 = vsyncpa [#allocation4], 1 }

</bundles_post_ra>
